<compile_context>
chip_gen: v5e
topology: v5e:2x2
jax: 0.10.0
libtpu: 0.0.40
codegen_flags: <defaults>
</compile_context>

<pallas_src>
import math
import functools

import jax
import jax.numpy as jnp
from jax import lax
from jax.experimental import pallas as pl
from jax.experimental.pallas import tpu as pltpu


# ----------------------------- kernel -----------------------------------------

def _layer_norm(x, gamma, beta, eps=1e-5):
    mu = jnp.mean(x, axis=-1, keepdims=True)
    var = jnp.mean((x - mu) ** 2, axis=-1, keepdims=True)
    return (x - mu) * lax.rsqrt(var + eps) * gamma + beta


def transformer_layer_kernel(ids_ref, emb_ref, pe_ref, wqkv_ref, wo_ref, w1_ref,
                             w2_ref, vecs_ref, out_ref,
                             x_ref, qkv_ref, heads_ref, *, nheads):
    """One (batch b, layer l) grid step of the TransformerNet forward.

    ids_ref  : (S, 1) int32 token ids for batch b
    emb_ref  : (V, E) bf16            pe_ref : (S, E) f32
    wqkv_ref : (E, 3E) bf16  (1/sqrt(hd) folded into the Q columns)
    wo_ref   : (E, E)  bf16           w1_ref : (E, H) bf16       w2_ref : (H, E) bf16
    vecs_ref : (8, max(3E,H)) f32 packed rows [bqkv | bo | b1 | b2 | g1 | be1 | g2 | be2]
    out_ref  : (S, E) f32 output slab for batch b (written at the last layer)
    x_ref    : VMEM (S, E)  f32   residual stream, carried across the layer axis
    qkv_ref  : VMEM (S, 3E) bf16  fused Q|K|V projection
    heads_ref: VMEM (S, E)  bf16  per-head attention outputs packed along lanes
    """
    V, E = emb_ref.shape
    S = pe_ref.shape[0]
    H = w1_ref.shape[1]
    hd = E // nheads

    l = pl.program_id(1)
    n_layers = pl.num_programs(1)

    # ---- layer 0 only: embedding gather (in-kernel one-hot -> MXU) + positional encoding ----
    # TODO(synk): at production vocab sizes, replace the one-hot matmul with a scalar-prefetch
    # (SMEM ids) + per-row DMA gather of embedding rows; at V=50 the one-hot is cheapest.
    @pl.when(l == 0)
    def _():
        ids = ids_ref[...]                                              # (S, 1) int32
        vocab_iota = lax.broadcasted_iota(jnp.int32, (S, V), 1)
        onehot = (vocab_iota == ids).astype(jnp.bfloat16)               # (S, V)
        x0 = jnp.dot(onehot, emb_ref[...], preferred_element_type=jnp.float32)  # (S, E) f32
        x_ref[...] = x0 + pe_ref[...]                                   # dropout == identity

    # packed per-layer vectors (loaded straight from the ref)
    bqkv = vecs_ref[0:1, :3 * E]
    bo = vecs_ref[1:2, :E]
    b1 = vecs_ref[2:3, :H]
    b2 = vecs_ref[3:4, :E]
    g1 = vecs_ref[4:5, :E]
    be1 = vecs_ref[5:6, :E]
    g2 = vecs_ref[6:7, :E]
    be2 = vecs_ref[7:8, :E]

    x = x_ref[...]                                                      # (S, E) f32

    # ---- multi-head self attention ----
    qkv_ref[...] = (jnp.dot(x.astype(jnp.bfloat16), wqkv_ref[...],
                            preferred_element_type=jnp.float32) + bqkv
                    ).astype(jnp.bfloat16)                              # (S, 3E)

    for h in range(nheads):                                             # static loop over heads
        c = h * hd
        qh = qkv_ref[:, c:c + hd]              # (S, hd) bf16, scale pre-folded into Wq/bq
        kh = qkv_ref[:, E + c:E + c + hd]
        vh = qkv_ref[:, 2 * E + c:2 * E + c + hd]
        # scores = q @ k^T without materializing a transpose
        s = lax.dot_general(qh, kh, (((1,), (1,)), ((), ())),
                            preferred_element_type=jnp.float32)         # (S, S) f32
        s = s - jnp.max(s, axis=-1, keepdims=True)
        p = jnp.exp(s)
        # approx reciprocal on the EUP; use approx=False if bit-level softmax parity is needed
        p = p * pl.reciprocal(jnp.sum(p, axis=-1, keepdims=True), approx=True)
        oh = jnp.dot(p.astype(jnp.bfloat16), vh,
                     preferred_element_type=jnp.float32)                # (S, hd) f32
        heads_ref[:, c:c + hd] = oh.astype(jnp.bfloat16)                # pack heads along lanes

    # single output projection over all heads
    attn = jnp.dot(heads_ref[...], wo_ref[...],
                   preferred_element_type=jnp.float32) + bo             # (S, E) f32

    # residual + norm1 (attention dropout == identity)
    x = _layer_norm(x + attn, g1, be1)

    # ---- feed forward (ReLU) ----
    ff = jnp.dot(x.astype(jnp.bfloat16), w1_ref[...],
                 preferred_element_type=jnp.float32) + b1
    ff = jnp.maximum(ff, 0.0)
    ff = jnp.dot(ff.astype(jnp.bfloat16), w2_ref[...],
                 preferred_element_type=jnp.float32) + b2

    # residual + norm2
    x = _layer_norm(x + ff, g2, be2)
    x_ref[...] = x

    @pl.when(l == n_layers - 1)
    def _():
        out_ref[...] = x


# ----------------------------- wrapper -----------------------------------------

def transformer_net_forward(src, params, *, nheads):
    """src: (B, S) int32 token ids -> (S, B, E) float32 (seq-first, like PyTorch)."""
    B, S = src.shape
    V, E = params["emb"].shape
    n_layers, _, H = params["w1"].shape
    W = params["vecs"].shape[2]

    ids = src.reshape(B, S, 1).astype(jnp.int32)
    pe = params["pe"][:S]

    kernel = functools.partial(transformer_layer_kernel, nheads=nheads)

    grid_spec = pltpu.PrefetchScalarGridSpec(
        num_scalar_prefetch=0,
        grid=(B, n_layers),                       # batch parallel, layers sequential
        in_specs=[
            pl.BlockSpec((None, S, 1), lambda b, l: (b, 0, 0)),        # ids (per batch)
            pl.BlockSpec((V, E), lambda b, l: (0, 0)),                 # embedding table
            pl.BlockSpec((S, E), lambda b, l: (0, 0)),                 # positional encoding
            pl.BlockSpec((None, E, 3 * E), lambda b, l: (l, 0, 0)),    # wqkv (per layer)
            pl.BlockSpec((None, E, E), lambda b, l: (l, 0, 0)),        # wo
            pl.BlockSpec((None, E, H), lambda b, l: (l, 0, 0)),        # w1
            pl.BlockSpec((None, H, E), lambda b, l: (l, 0, 0)),        # w2
            pl.BlockSpec((None, 8, W), lambda b, l: (l, 0, 0)),        # packed biases / LN params
        ],
        out_specs=pl.BlockSpec((None, S, E), lambda b, l: (b, 0, 0)),  # (B, S, E)
        scratch_shapes=[
            pltpu.VMEM((S, E), jnp.float32),        # residual stream (carried across layers)
            pltpu.VMEM((S, 3 * E), jnp.bfloat16),   # fused Q|K|V
            pltpu.VMEM((S, E), jnp.bfloat16),       # per-head outputs
        ],
    )

    out = pl.pallas_call(
        kernel,
        out_shape=jax.ShapeDtypeStruct((B, S, E), jnp.float32),
        grid_spec=grid_spec,
        compiler_params=pltpu.CompilerParams(
            dimension_semantics=("parallel", "arbitrary"),
            vmem_limit_bytes=32 * 1024 * 1024,
        ),
    )(ids, params["emb"], pe, params["wqkv"], params["wo"],
      params["w1"], params["w2"], params["vecs"])

    # TODO(synk): tiny (B,S,E)->(S,B,E) layout flip kept in the wrapper; writing a (S,1,E)
    # window per batch would violate the TPU (8,128)/full-dim block rule on the second-minor
    # dim at B=2, and at these sizes the transpose is noise.
    return jnp.transpose(out, (1, 0, 2))


# ----------------------------- parameter setup ----------------------------------

def make_positional_encoding(max_len, d_model):
    position = jnp.arange(max_len, dtype=jnp.float32)[:, None]
    div_term = jnp.exp(jnp.arange(0, d_model, 2, dtype=jnp.float32)
                       * (-math.log(10000.0) / d_model))
    pe = jnp.zeros((max_len, d_model), jnp.float32)
    pe = pe.at[:, 0::2].set(jnp.sin(position * div_term))
    pe = pe.at[:, 1::2].set(jnp.cos(position * div_term))
    return pe


def init_params(key, *, num_src_vocab, embedding_dim, hidden_size, nheads,
                n_layers, max_src_len):
    E, H, V = embedding_dim, hidden_size, num_src_vocab
    hd = E // nheads
    assert E % nheads == 0
    vw = max(3 * E, H)                       # packed-vector row width
    attn_scale = 1.0 / math.sqrt(hd)

    keys = jax.random.split(key, 1 + 6 * n_layers)
    scale = 0.05

    wqkv_l, wo_l, w1_l, w2_l, vecs_l = [], [], [], [], []
    for l in range(n_layers):
        k = keys[1 + 6 * l: 1 + 6 * (l + 1)]
        # weights pre-transposed for x @ W
        wqkv = scale * jax.random.normal(k[0], (E, 3 * E), jnp.float32)
        bqkv = scale * jax.random.normal(k[1], (3 * E,), jnp.float32)
        # fold the 1/sqrt(head_dim) attention scale into the Q projection (weights + bias)
        wqkv = wqkv.at[:, :E].multiply(attn_scale)
        bqkv = bqkv.at[:E].multiply(attn_scale)

        wo = scale * jax.random.normal(k[2], (E, E), jnp.float32)      # un-split Wo
        bo = scale * jax.random.normal(k[3], (E,), jnp.float32)
        w1 = scale * jax.random.normal(k[4], (E, H), jnp.float32)
        w2 = scale * jax.random.normal(k[5], (H, E), jnp.float32)

        wqkv_l.append(wqkv); wo_l.append(wo); w1_l.append(w1); w2_l.append(w2)

        # packed per-layer vectors: rows = [bqkv, bo, b1, b2, g1, be1, g2, be2]
        vec = jnp.zeros((8, vw), jnp.float32)
        vec = vec.at[0, :3 * E].set(bqkv)
        vec = vec.at[1, :E].set(bo)
        # b1 (row 2), b2 (row 3), be1 (row 5), be2 (row 7) stay zero
        vec = vec.at[4, :E].set(1.0)         # g1
        vec = vec.at[6, :E].set(1.0)         # g2
        vecs_l.append(vec)

    return {
        # matmul operands in bf16 (f32 accumulation in-kernel); LN/softmax params stay f32
        "emb": (scale * jax.random.normal(keys[0], (V, E), jnp.float32)).astype(jnp.bfloat16),
        "pe": make_positional_encoding(max_src_len, E),
        "wqkv": jnp.stack(wqkv_l).astype(jnp.bfloat16),   # (L, E, 3E)
        "wo": jnp.stack(wo_l).astype(jnp.bfloat16),       # (L, E, E)
        "w1": jnp.stack(w1_l).astype(jnp.bfloat16),       # (L, E, H)
        "w2": jnp.stack(w2_l).astype(jnp.bfloat16),       # (L, H, E)
        "vecs": jnp.stack(vecs_l),                        # (L, 8, max(3E,H)) f32
    }


# ----------------------------- main ----------------------------------------------

if __name__ == "__main__":
    # TransformerNet(num_src_vocab=50, embedding_dim=32, hidden_size=64,
    #                nheads=4, n_layers=2, max_src_len=16, dropout=0.1)
    NUM_SRC_VOCAB = 50
    EMBEDDING_DIM = 32
    HIDDEN_SIZE = 64
    NHEADS = 4
    N_LAYERS = 2
    MAX_SRC_LEN = 16

    BATCH = 2
    SEQ = 8

    root = jax.random.PRNGKey(0)
    k_params, k_src = jax.random.split(root)

    params = init_params(
        k_params,
        num_src_vocab=NUM_SRC_VOCAB,
        embedding_dim=EMBEDDING_DIM,
        hidden_size=HIDDEN_SIZE,
        nheads=NHEADS,
        n_layers=N_LAYERS,
        max_src_len=MAX_SRC_LEN,
    )
    src = jax.random.randint(k_src, (BATCH, SEQ), 0, NUM_SRC_VOCAB, dtype=jnp.int32)

    # TODO(synk): dropout layers are identity (eval-mode semantics); training-mode dropout not modeled.
    out = transformer_net_forward(src, params, nheads=NHEADS)       # (SEQ, BATCH, EMBEDDING_DIM)
    out = jax.block_until_ready(out)
    assert out.shape == (SEQ, BATCH, EMBEDDING_DIM)
    assert bool(jnp.all(jnp.isfinite(out)))
    print("KERNEL_OK")
</pallas_src>

<mosaic_0001>
module attributes {stable_mosaic.version = 11 : i64} {
  func.func @transformer_layer_kernel(%arg0: i32, %arg1: i32, %arg2: memref<1x8x1xi32, #tpu.memory_space<vmem>>, %arg3: memref<50x32xbf16, #tpu.memory_space<vmem>>, %arg4: memref<8x32xf32, #tpu.memory_space<vmem>>, %arg5: memref<1x32x96xbf16, #tpu.memory_space<vmem>>, %arg6: memref<1x32x32xbf16, #tpu.memory_space<vmem>>, %arg7: memref<1x32x64xbf16, #tpu.memory_space<vmem>>, %arg8: memref<1x64x32xbf16, #tpu.memory_space<vmem>>, %arg9: memref<1x8x96xf32, #tpu.memory_space<vmem>>, %arg10: memref<1x8x32xf32, #tpu.memory_space<vmem>>, %arg11: memref<8x32xf32, #tpu.memory_space<vmem>>, %arg12: memref<8x96xbf16, #tpu.memory_space<vmem>>, %arg13: memref<8x32xbf16, #tpu.memory_space<vmem>>) attributes {dimension_semantics = [#tpu.dimension_semantics<parallel>, #tpu.dimension_semantics<arbitrary>], iteration_bounds = array<i64: 2, 2>, scalar_prefetch = 0 : i64, scratch_operands = 3 : i64, tpu.core_type = #tpu.core_type<tc>, window_params = [{transform_indices = @transform_0, window_bounds = array<i64: 1, 8, 1>}, {pipeline_mode = #tpu.pipeline_mode<synchronous>, transform_indices = @transform_1, window_bounds = array<i64: 50, 32>}, {pipeline_mode = #tpu.pipeline_mode<synchronous>, transform_indices = @transform_2, window_bounds = array<i64: 8, 32>}, {transform_indices = @transform_3, window_bounds = array<i64: 1, 32, 96>}, {transform_indices = @transform_4, window_bounds = array<i64: 1, 32, 32>}, {transform_indices = @transform_5, window_bounds = array<i64: 1, 32, 64>}, {transform_indices = @transform_6, window_bounds = array<i64: 1, 64, 32>}, {transform_indices = @transform_7, window_bounds = array<i64: 1, 8, 96>}, {transform_indices = @transform_8, window_bounds = array<i64: 1, 8, 32>}]} {
    %c0_i32 = arith.constant 0 : i32
    %0 = arith.cmpi eq, %arg1, %c0_i32 : i32
    %1 = arith.extui %0 : i1 to i32
    %c0_i32_0 = arith.constant 0 : i32
    %2 = arith.cmpi ne, %1, %c0_i32_0 : i32
    scf.if %2 {
      %c0_89 = arith.constant 0 : index
      %c0_90 = arith.constant 0 : index
      %c0_91 = arith.constant 0 : index
      %170 = vector.load %arg2[%c0_89, %c0_90, %c0_91] : memref<1x8x1xi32, #tpu.memory_space<vmem>>, vector<1x8x1xi32>
      %171 = vector.shape_cast %170 : vector<1x8x1xi32> to vector<8x1xi32>
      %172 = tpu.iota {dimensions = array<i32: 1>} : vector<8x50xi32>
      %173 = vector.broadcast %171 : vector<8x1xi32> to vector<8x50xi32>
      %174 = arith.cmpi eq, %172, %173 : vector<8x50xi32>
      %175 = arith.extui %174 : vector<8x50xi1> to vector<8x50xi32>
      %176 = arith.sitofp %175 : vector<8x50xi32> to vector<8x50xf32>
      %177 = arith.truncf %176 : vector<8x50xf32> to vector<8x50xbf16>
      %c0_92 = arith.constant 0 : index
      %c0_93 = arith.constant 0 : index
      %178 = vector.load %arg3[%c0_92, %c0_93] : memref<50x32xbf16, #tpu.memory_space<vmem>>, vector<50x32xbf16>
      %cst_94 = arith.constant dense<0.000000e+00> : vector<8x32xf32>
      %179 = tpu.matmul %177, %178, %cst_94 {dimension_numbers = #tpu.dot_dimension_numbers<[1], [0], [0], [1], [0, 0, 1, 1], [], []>} : vector<8x50xbf16>, vector<50x32xbf16>, vector<8x32xf32> -> vector<8x32xf32>
      %c0_95 = arith.constant 0 : index
      %c0_96 = arith.constant 0 : index
      %180 = vector.load %arg4[%c0_95, %c0_96] : memref<8x32xf32, #tpu.memory_space<vmem>>, vector<8x32xf32>
      %181 = arith.addf %179, %180 : vector<8x32xf32>
      %c0_97 = arith.constant 0 : index
      %c0_98 = arith.constant 0 : index
      %182 = vector.load %arg11[%c0_97, %c0_98] : memref<8x32xf32, #tpu.memory_space<vmem>>, vector<8x32xf32>
      tpu.vector_store %arg11[%c0_97, %c0_98], %181 {strides = array<i32>} : memref<8x32xf32, #tpu.memory_space<vmem>>, vector<8x32xf32>,
    } else {
    }
    %c0 = arith.constant 0 : index
    %c0_1 = arith.constant 0 : index
    %c0_2 = arith.constant 0 : index
    %3 = vector.load %arg9[%c0, %c0_1, %c0_2] : memref<1x8x96xf32, #tpu.memory_space<vmem>>, vector<1x1x96xf32>
    %4 = vector.shape_cast %3 : vector<1x1x96xf32> to vector<1x96xf32>
    %c0_3 = arith.constant 0 : index
    %c1 = arith.constant 1 : index
    %c0_4 = arith.constant 0 : index
    %5 = vector.load %arg9[%c0_3, %c1, %c0_4] : memref<1x8x96xf32, #tpu.memory_space<vmem>>, vector<1x1x32xf32>
    %6 = vector.shape_cast %5 : vector<1x1x32xf32> to vector<1x32xf32>
    %c0_5 = arith.constant 0 : index
    %c2 = arith.constant 2 : index
    %c0_6 = arith.constant 0 : index
    %7 = vector.load %arg9[%c0_5, %c2, %c0_6] : memref<1x8x96xf32, #tpu.memory_space<vmem>>, vector<1x1x64xf32>
    %8 = vector.shape_cast %7 : vector<1x1x64xf32> to vector<1x64xf32>
    %c0_7 = arith.constant 0 : index
    %c3 = arith.constant 3 : index
    %c0_8 = arith.constant 0 : index
    %9 = vector.load %arg9[%c0_7, %c3, %c0_8] : memref<1x8x96xf32, #tpu.memory_space<vmem>>, vector<1x1x32xf32>
    %10 = vector.shape_cast %9 : vector<1x1x32xf32> to vector<1x32xf32>
    %c0_9 = arith.constant 0 : index
    %c4 = arith.constant 4 : index
    %c0_10 = arith.constant 0 : index
    %11 = vector.load %arg9[%c0_9, %c4, %c0_10] : memref<1x8x96xf32, #tpu.memory_space<vmem>>, vector<1x1x32xf32>
    %12 = vector.shape_cast %11 : vector<1x1x32xf32> to vector<1x32xf32>
    %c0_11 = arith.constant 0 : index
    %c5 = arith.constant 5 : index
    %c0_12 = arith.constant 0 : index
    %13 = vector.load %arg9[%c0_11, %c5, %c0_12] : memref<1x8x96xf32, #tpu.memory_space<vmem>>, vector<1x1x32xf32>
    %14 = vector.shape_cast %13 : vector<1x1x32xf32> to vector<1x32xf32>
    %c0_13 = arith.constant 0 : index
    %c6 = arith.constant 6 : index
    %c0_14 = arith.constant 0 : index
    %15 = vector.load %arg9[%c0_13, %c6, %c0_14] : memref<1x8x96xf32, #tpu.memory_space<vmem>>, vector<1x1x32xf32>
    %16 = vector.shape_cast %15 : vector<1x1x32xf32> to vector<1x32xf32>
    %c0_15 = arith.constant 0 : index
    %c7 = arith.constant 7 : index
    %c0_16 = arith.constant 0 : index
    %17 = vector.load %arg9[%c0_15, %c7, %c0_16] : memref<1x8x96xf32, #tpu.memory_space<vmem>>, vector<1x1x32xf32>
    %18 = vector.shape_cast %17 : vector<1x1x32xf32> to vector<1x32xf32>
    %c0_17 = arith.constant 0 : index
    %c0_18 = arith.constant 0 : index
    %19 = vector.load %arg11[%c0_17, %c0_18] : memref<8x32xf32, #tpu.memory_space<vmem>>, vector<8x32xf32>
    %20 = arith.truncf %19 : vector<8x32xf32> to vector<8x32xbf16>
    %c0_19 = arith.constant 0 : index
    %c0_20 = arith.constant 0 : index
    %c0_21 = arith.constant 0 : index
    %21 = vector.load %arg5[%c0_19, %c0_20, %c0_21] : memref<1x32x96xbf16, #tpu.memory_space<vmem>>, vector<1x32x96xbf16>
    %22 = vector.shape_cast %21 : vector<1x32x96xbf16> to vector<32x96xbf16>
    %cst = arith.constant dense<0.000000e+00> : vector<8x96xf32>
    %23 = tpu.matmul %20, %22, %cst {dimension_numbers = #tpu.dot_dimension_numbers<[1], [0], [0], [1], [0, 0, 1, 1], [], []>} : vector<8x32xbf16>, vector<32x96xbf16>, vector<8x96xf32> -> vector<8x96xf32>
    %24 = vector.broadcast %4 : vector<1x96xf32> to vector<8x96xf32>
    %25 = arith.addf %23, %24 : vector<8x96xf32>
    %26 = arith.truncf %25 : vector<8x96xf32> to vector<8x96xbf16>
    %c0_22 = arith.constant 0 : index
    %c0_23 = arith.constant 0 : index
    %27 = vector.load %arg12[%c0_22, %c0_23] : memref<8x96xbf16, #tpu.memory_space<vmem>>, vector<8x96xbf16>
    tpu.vector_store %arg12[%c0_22, %c0_23], %26 {strides = array<i32>} : memref<8x96xbf16, #tpu.memory_space<vmem>>, vector<8x96xbf16>,
    %c0_24 = arith.constant 0 : index
    %c0_25 = arith.constant 0 : index
    %28 = vector.load %arg12[%c0_24, %c0_25] : memref<8x96xbf16, #tpu.memory_space<vmem>>, vector<8x8xbf16>
    %c0_26 = arith.constant 0 : index
    %c32 = arith.constant 32 : index
    %29 = vector.load %arg12[%c0_26, %c32] : memref<8x96xbf16, #tpu.memory_space<vmem>>, vector<8x8xbf16>
    %c0_27 = arith.constant 0 : index
    %c64 = arith.constant 64 : index
    %30 = vector.load %arg12[%c0_27, %c64] : memref<8x96xbf16, #tpu.memory_space<vmem>>, vector<8x8xbf16>
    %cst_28 = arith.constant dense<0.000000e+00> : vector<8x8xf32>
    %31 = tpu.matmul %28, %29, %cst_28 {dimension_numbers = #tpu.dot_dimension_numbers<[1], [1], [0], [0], [0, 0, 1, 0], [], []>} : vector<8x8xbf16>, vector<8x8xbf16>, vector<8x8xf32> -> vector<8x8xf32>
    %cst_29 = arith.constant dense<0xFF800000> : vector<8xf32>
    %32 = vector.multi_reduction <maximumf>, %31, %cst_29 [1] : vector<8x8xf32> to vector<8xf32>
    %33 = vector.shape_cast %32 : vector<8xf32> to vector<8x1xf32>
    %34 = vector.broadcast %33 : vector<8x1xf32> to vector<8x8xf32>
    %35 = arith.subf %31, %34 : vector<8x8xf32>
    %36 = math.exp %35 : vector<8x8xf32>
    %cst_30 = arith.constant dense<0.000000e+00> : vector<8xf32>
    %37 = vector.multi_reduction <add>, %36, %cst_30 [1] : vector<8x8xf32> to vector<8xf32>
    %38 = vector.shape_cast %37 : vector<8xf32> to vector<8x1xf32>
    %39 = tpu.reciprocal %38 {approx = true} : vector<8x1xf32> -> vector<8x1xf32>
    %40 = vector.broadcast %39 : vector<8x1xf32> to vector<8x8xf32>
    %41 = arith.mulf %36, %40 : vector<8x8xf32>
    %42 = arith.truncf %41 : vector<8x8xf32> to vector<8x8xbf16>
    %cst_31 = arith.constant dense<0.000000e+00> : vector<8x8xf32>
    %43 = tpu.matmul %42, %30, %cst_31 {dimension_numbers = #tpu.dot_dimension_numbers<[1], [0], [0], [1], [0, 0, 1, 1], [], []>} : vector<8x8xbf16>, vector<8x8xbf16>, vector<8x8xf32> -> vector<8x8xf32>
    %44 = arith.truncf %43 : vector<8x8xf32> to vector<8x8xbf16>
    %c0_32 = arith.constant 0 : index
    %c0_33 = arith.constant 0 : index
    %45 = vector.load %arg13[%c0_32, %c0_33] : memref<8x32xbf16, #tpu.memory_space<vmem>>, vector<8x8xbf16>
    tpu.vector_store %arg13[%c0_32, %c0_33], %44 {strides = array<i32>} : memref<8x32xbf16, #tpu.memory_space<vmem>>, vector<8x8xbf16>,
    %c0_34 = arith.constant 0 : index
    %c8 = arith.constant 8 : index
    %46 = vector.load %arg12[%c0_34, %c8] : memref<8x96xbf16, #tpu.memory_space<vmem>>, vector<8x8xbf16>
    %c0_35 = arith.constant 0 : index
    %c40 = arith.constant 40 : index
    %47 = vector.load %arg12[%c0_35, %c40] : memref<8x96xbf16, #tpu.memory_space<vmem>>, vector<8x8xbf16>
    %c0_36 = arith.constant 0 : index
    %c72 = arith.constant 72 : index
    %48 = vector.load %arg12[%c0_36, %c72] : memref<8x96xbf16, #tpu.memory_space<vmem>>, vector<8x8xbf16>
    %cst_37 = arith.constant dense<0.000000e+00> : vector<8x8xf32>
    %49 = tpu.matmul %46, %47, %cst_37 {dimension_numbers = #tpu.dot_dimension_numbers<[1], [1], [0], [0], [0, 0, 1, 0], [], []>} : vector<8x8xbf16>, vector<8x8xbf16>, vector<8x8xf32> -> vector<8x8xf32>
    %cst_38 = arith.constant dense<0xFF800000> : vector<8xf32>
    %50 = vector.multi_reduction <maximumf>, %49, %cst_38 [1] : vector<8x8xf32> to vector<8xf32>
    %51 = vector.shape_cast %50 : vector<8xf32> to vector<8x1xf32>
    %52 = vector.broadcast %51 : vector<8x1xf32> to vector<8x8xf32>
    %53 = arith.subf %49, %52 : vector<8x8xf32>
    %54 = math.exp %53 : vector<8x8xf32>
    %cst_39 = arith.constant dense<0.000000e+00> : vector<8xf32>
    %55 = vector.multi_reduction <add>, %54, %cst_39 [1] : vector<8x8xf32> to vector<8xf32>
    %56 = vector.shape_cast %55 : vector<8xf32> to vector<8x1xf32>
    %57 = tpu.reciprocal %56 {approx = true} : vector<8x1xf32> -> vector<8x1xf32>
    %58 = vector.broadcast %57 : vector<8x1xf32> to vector<8x8xf32>
    %59 = arith.mulf %54, %58 : vector<8x8xf32>
    %60 = arith.truncf %59 : vector<8x8xf32> to vector<8x8xbf16>
    %cst_40 = arith.constant dense<0.000000e+00> : vector<8x8xf32>
    %61 = tpu.matmul %60, %48, %cst_40 {dimension_numbers = #tpu.dot_dimension_numbers<[1], [0], [0], [1], [0, 0, 1, 1], [], []>} : vector<8x8xbf16>, vector<8x8xbf16>, vector<8x8xf32> -> vector<8x8xf32>
    %62 = arith.truncf %61 : vector<8x8xf32> to vector<8x8xbf16>
    %c0_41 = arith.constant 0 : index
    %c8_42 = arith.constant 8 : index
    %63 = vector.load %arg13[%c0_41, %c8_42] : memref<8x32xbf16, #tpu.memory_space<vmem>>, vector<8x8xbf16>
    tpu.vector_store %arg13[%c0_41, %c8_42], %62 {strides = array<i32>} : memref<8x32xbf16, #tpu.memory_space<vmem>>, vector<8x8xbf16>,
    %c0_43 = arith.constant 0 : index
    %c16 = arith.constant 16 : index
    %64 = vector.load %arg12[%c0_43, %c16] : memref<8x96xbf16, #tpu.memory_space<vmem>>, vector<8x8xbf16>
    %c0_44 = arith.constant 0 : index
    %c48 = arith.constant 48 : index
    %65 = vector.load %arg12[%c0_44, %c48] : memref<8x96xbf16, #tpu.memory_space<vmem>>, vector<8x8xbf16>
    %c0_45 = arith.constant 0 : index
    %c80 = arith.constant 80 : index
    %66 = vector.load %arg12[%c0_45, %c80] : memref<8x96xbf16, #tpu.memory_space<vmem>>, vector<8x8xbf16>
    %cst_46 = arith.constant dense<0.000000e+00> : vector<8x8xf32>
    %67 = tpu.matmul %64, %65, %cst_46 {dimension_numbers = #tpu.dot_dimension_numbers<[1], [1], [0], [0], [0, 0, 1, 0], [], []>} : vector<8x8xbf16>, vector<8x8xbf16>, vector<8x8xf32> -> vector<8x8xf32>
    %cst_47 = arith.constant dense<0xFF800000> : vector<8xf32>
    %68 = vector.multi_reduction <maximumf>, %67, %cst_47 [1] : vector<8x8xf32> to vector<8xf32>
    %69 = vector.shape_cast %68 : vector<8xf32> to vector<8x1xf32>
    %70 = vector.broadcast %69 : vector<8x1xf32> to vector<8x8xf32>
    %71 = arith.subf %67, %70 : vector<8x8xf32>
    %72 = math.exp %71 : vector<8x8xf32>
    %cst_48 = arith.constant dense<0.000000e+00> : vector<8xf32>
    %73 = vector.multi_reduction <add>, %72, %cst_48 [1] : vector<8x8xf32> to vector<8xf32>
    %74 = vector.shape_cast %73 : vector<8xf32> to vector<8x1xf32>
    %75 = tpu.reciprocal %74 {approx = true} : vector<8x1xf32> -> vector<8x1xf32>
    %76 = vector.broadcast %75 : vector<8x1xf32> to vector<8x8xf32>
    %77 = arith.mulf %72, %76 : vector<8x8xf32>
    %78 = arith.truncf %77 : vector<8x8xf32> to vector<8x8xbf16>
    %cst_49 = arith.constant dense<0.000000e+00> : vector<8x8xf32>
    %79 = tpu.matmul %78, %66, %cst_49 {dimension_numbers = #tpu.dot_dimension_numbers<[1], [0], [0], [1], [0, 0, 1, 1], [], []>} : vector<8x8xbf16>, vector<8x8xbf16>, vector<8x8xf32> -> vector<8x8xf32>
    %80 = arith.truncf %79 : vector<8x8xf32> to vector<8x8xbf16>
    %c0_50 = arith.constant 0 : index
    %c16_51 = arith.constant 16 : index
    %81 = vector.load %arg13[%c0_50, %c16_51] : memref<8x32xbf16, #tpu.memory_space<vmem>>, vector<8x8xbf16>
    tpu.vector_store %arg13[%c0_50, %c16_51], %80 {strides = array<i32>} : memref<8x32xbf16, #tpu.memory_space<vmem>>, vector<8x8xbf16>,
    %c0_52 = arith.constant 0 : index
    %c24 = arith.constant 24 : index
    %82 = vector.load %arg12[%c0_52, %c24] : memref<8x96xbf16, #tpu.memory_space<vmem>>, vector<8x8xbf16>
    %c0_53 = arith.constant 0 : index
    %c56 = arith.constant 56 : index
    %83 = vector.load %arg12[%c0_53, %c56] : memref<8x96xbf16, #tpu.memory_space<vmem>>, vector<8x8xbf16>
    %c0_54 = arith.constant 0 : index
    %c88 = arith.constant 88 : index
    %84 = vector.load %arg12[%c0_54, %c88] : memref<8x96xbf16, #tpu.memory_space<vmem>>, vector<8x8xbf16>
    %cst_55 = arith.constant dense<0.000000e+00> : vector<8x8xf32>
    %85 = tpu.matmul %82, %83, %cst_55 {dimension_numbers = #tpu.dot_dimension_numbers<[1], [1], [0], [0], [0, 0, 1, 0], [], []>} : vector<8x8xbf16>, vector<8x8xbf16>, vector<8x8xf32> -> vector<8x8xf32>
    %cst_56 = arith.constant dense<0xFF800000> : vector<8xf32>
    %86 = vector.multi_reduction <maximumf>, %85, %cst_56 [1] : vector<8x8xf32> to vector<8xf32>
    %87 = vector.shape_cast %86 : vector<8xf32> to vector<8x1xf32>
    %88 = vector.broadcast %87 : vector<8x1xf32> to vector<8x8xf32>
    %89 = arith.subf %85, %88 : vector<8x8xf32>
    %90 = math.exp %89 : vector<8x8xf32>
    %cst_57 = arith.constant dense<0.000000e+00> : vector<8xf32>
    %91 = vector.multi_reduction <add>, %90, %cst_57 [1] : vector<8x8xf32> to vector<8xf32>
    %92 = vector.shape_cast %91 : vector<8xf32> to vector<8x1xf32>
    %93 = tpu.reciprocal %92 {approx = true} : vector<8x1xf32> -> vector<8x1xf32>
    %94 = vector.broadcast %93 : vector<8x1xf32> to vector<8x8xf32>
    %95 = arith.mulf %90, %94 : vector<8x8xf32>
    %96 = arith.truncf %95 : vector<8x8xf32> to vector<8x8xbf16>
    %cst_58 = arith.constant dense<0.000000e+00> : vector<8x8xf32>
    %97 = tpu.matmul %96, %84, %cst_58 {dimension_numbers = #tpu.dot_dimension_numbers<[1], [0], [0], [1], [0, 0, 1, 1], [], []>} : vector<8x8xbf16>, vector<8x8xbf16>, vector<8x8xf32> -> vector<8x8xf32>
    %98 = arith.truncf %97 : vector<8x8xf32> to vector<8x8xbf16>
    %c0_59 = arith.constant 0 : index
    %c24_60 = arith.constant 24 : index
    %99 = vector.load %arg13[%c0_59, %c24_60] : memref<8x32xbf16, #tpu.memory_space<vmem>>, vector<8x8xbf16>
    tpu.vector_store %arg13[%c0_59, %c24_60], %98 {strides = array<i32>} : memref<8x32xbf16, #tpu.memory_space<vmem>>, vector<8x8xbf16>,
    %c0_61 = arith.constant 0 : index
    %c0_62 = arith.constant 0 : index
    %100 = vector.load %arg13[%c0_61, %c0_62] : memref<8x32xbf16, #tpu.memory_space<vmem>>, vector<8x32xbf16>
    %c0_63 = arith.constant 0 : index
    %c0_64 = arith.constant 0 : index
    %c0_65 = arith.constant 0 : index
    %101 = vector.load %arg6[%c0_63, %c0_64, %c0_65] : memref<1x32x32xbf16, #tpu.memory_space<vmem>>, vector<1x32x32xbf16>
    %102 = vector.shape_cast %101 : vector<1x32x32xbf16> to vector<32x32xbf16>
    %cst_66 = arith.constant dense<0.000000e+00> : vector<8x32xf32>
    %103 = tpu.matmul %100, %102, %cst_66 {dimension_numbers = #tpu.dot_dimension_numbers<[1], [0], [0], [1], [0, 0, 1, 1], [], []>} : vector<8x32xbf16>, vector<32x32xbf16>, vector<8x32xf32> -> vector<8x32xf32>
    %104 = vector.broadcast %6 : vector<1x32xf32> to vector<8x32xf32>
    %105 = arith.addf %103, %104 : vector<8x32xf32>
    %106 = arith.addf %19, %105 : vector<8x32xf32>
    %cst_67 = arith.constant dense<0.000000e+00> : vector<8xf32>
    %107 = vector.multi_reduction <add>, %106, %cst_67 [1] : vector<8x32xf32> to vector<8xf32>
    %108 = vector.shape_cast %107 : vector<8xf32> to vector<8x1xf32>
    %cst_68 = arith.constant 3.200000e+01 : f32
    %109 = vector.broadcast %cst_68 : f32 to vector<8x1xf32>
    %110 = arith.divf %108, %109 : vector<8x1xf32>
    %111 = vector.broadcast %110 : vector<8x1xf32> to vector<8x32xf32>
    %112 = arith.subf %106, %111 : vector<8x32xf32>
    %113 = arith.mulf %112, %112 : vector<8x32xf32>
    %cst_69 = arith.constant dense<0.000000e+00> : vector<8xf32>
    %114 = vector.multi_reduction <add>, %113, %cst_69 [1] : vector<8x32xf32> to vector<8xf32>
    %115 = vector.shape_cast %114 : vector<8xf32> to vector<8x1xf32>
    %cst_70 = arith.constant 3.200000e+01 : f32
    %116 = vector.broadcast %cst_70 : f32 to vector<8x1xf32>
    %117 = arith.divf %115, %116 : vector<8x1xf32>
    %118 = vector.broadcast %110 : vector<8x1xf32> to vector<8x32xf32>
    %119 = arith.subf %106, %118 : vector<8x32xf32>
    %cst_71 = arith.constant 9.99999974E-6 : f32
    %120 = vector.broadcast %cst_71 : f32 to vector<8x1xf32>
    %121 = arith.addf %117, %120 : vector<8x1xf32>
    %122 = math.rsqrt %121 : vector<8x1xf32>
    %123 = vector.broadcast %122 : vector<8x1xf32> to vector<8x32xf32>
    %124 = arith.mulf %119, %123 : vector<8x32xf32>
    %125 = vector.broadcast %12 : vector<1x32xf32> to vector<8x32xf32>
    %126 = arith.mulf %124, %125 : vector<8x32xf32>
    %127 = vector.broadcast %14 : vector<1x32xf32> to vector<8x32xf32>
    %128 = arith.addf %126, %127 : vector<8x32xf32>
    %129 = arith.truncf %128 : vector<8x32xf32> to vector<8x32xbf16>
    %c0_72 = arith.constant 0 : index
    %c0_73 = arith.constant 0 : index
    %c0_74 = arith.constant 0 : index
    %130 = vector.load %arg7[%c0_72, %c0_73, %c0_74] : memref<1x32x64xbf16, #tpu.memory_space<vmem>>, vector<1x32x64xbf16>
    %131 = vector.shape_cast %130 : vector<1x32x64xbf16> to vector<32x64xbf16>
    %cst_75 = arith.constant dense<0.000000e+00> : vector<8x64xf32>
    %132 = tpu.matmul %129, %131, %cst_75 {dimension_numbers = #tpu.dot_dimension_numbers<[1], [0], [0], [1], [0, 0, 1, 1], [], []>} : vector<8x32xbf16>, vector<32x64xbf16>, vector<8x64xf32> -> vector<8x64xf32>
    %133 = vector.broadcast %8 : vector<1x64xf32> to vector<8x64xf32>
    %134 = arith.addf %132, %133 : vector<8x64xf32>
    %cst_76 = arith.constant 0.000000e+00 : f32
    %135 = vector.broadcast %cst_76 : f32 to vector<8x64xf32>
    %136 = arith.maximumf %134, %135 : vector<8x64xf32>
    %137 = arith.truncf %136 : vector<8x64xf32> to vector<8x64xbf16>
    %c0_77 = arith.constant 0 : index
    %c0_78 = arith.constant 0 : index
    %c0_79 = arith.constant 0 : index
    %138 = vector.load %arg8[%c0_77, %c0_78, %c0_79] : memref<1x64x32xbf16, #tpu.memory_space<vmem>>, vector<1x64x32xbf16>
    %139 = vector.shape_cast %138 : vector<1x64x32xbf16> to vector<64x32xbf16>
    %cst_80 = arith.constant dense<0.000000e+00> : vector<8x32xf32>
    %140 = tpu.matmul %137, %139, %cst_80 {dimension_numbers = #tpu.dot_dimension_numbers<[1], [0], [0], [1], [0, 0, 1, 1], [], []>} : vector<8x64xbf16>, vector<64x32xbf16>, vector<8x32xf32> -> vector<8x32xf32>
    %141 = vector.broadcast %10 : vector<1x32xf32> to vector<8x32xf32>
    %142 = arith.addf %140, %141 : vector<8x32xf32>
    %143 = arith.addf %128, %142 : vector<8x32xf32>
    %cst_81 = arith.constant dense<0.000000e+00> : vector<8xf32>
    %144 = vector.multi_reduction <add>, %143, %cst_81 [1] : vector<8x32xf32> to vector<8xf32>
    %145 = vector.shape_cast %144 : vector<8xf32> to vector<8x1xf32>
    %cst_82 = arith.constant 3.200000e+01 : f32
    %146 = vector.broadcast %cst_82 : f32 to vector<8x1xf32>
    %147 = arith.divf %145, %146 : vector<8x1xf32>
    %148 = vector.broadcast %147 : vector<8x1xf32> to vector<8x32xf32>
    %149 = arith.subf %143, %148 : vector<8x32xf32>
    %150 = arith.mulf %149, %149 : vector<8x32xf32>
    %cst_83 = arith.constant dense<0.000000e+00> : vector<8xf32>
    %151 = vector.multi_reduction <add>, %150, %cst_83 [1] : vector<8x32xf32> to vector<8xf32>
    %152 = vector.shape_cast %151 : vector<8xf32> to vector<8x1xf32>
    %cst_84 = arith.constant 3.200000e+01 : f32
    %153 = vector.broadcast %cst_84 : f32 to vector<8x1xf32>
    %154 = arith.divf %152, %153 : vector<8x1xf32>
    %155 = vector.broadcast %147 : vector<8x1xf32> to vector<8x32xf32>
    %156 = arith.subf %143, %155 : vector<8x32xf32>
    %cst_85 = arith.constant 9.99999974E-6 : f32
    %157 = vector.broadcast %cst_85 : f32 to vector<8x1xf32>
    %158 = arith.addf %154, %157 : vector<8x1xf32>
    %159 = math.rsqrt %158 : vector<8x1xf32>
    %160 = vector.broadcast %159 : vector<8x1xf32> to vector<8x32xf32>
    %161 = arith.mulf %156, %160 : vector<8x32xf32>
    %162 = vector.broadcast %16 : vector<1x32xf32> to vector<8x32xf32>
    %163 = arith.mulf %161, %162 : vector<8x32xf32>
    %164 = vector.broadcast %18 : vector<1x32xf32> to vector<8x32xf32>
    %165 = arith.addf %163, %164 : vector<8x32xf32>
    %c0_86 = arith.constant 0 : index
    %c0_87 = arith.constant 0 : index
    %166 = vector.load %arg11[%c0_86, %c0_87] : memref<8x32xf32, #tpu.memory_space<vmem>>, vector<8x32xf32>
    tpu.vector_store %arg11[%c0_86, %c0_87], %165 {strides = array<i32>} : memref<8x32xf32, #tpu.memory_space<vmem>>, vector<8x32xf32>,
    %c1_i32 = arith.constant 1 : i32
    %167 = arith.cmpi eq, %arg1, %c1_i32 : i32
    %168 = arith.extui %167 : i1 to i32
    %c0_i32_88 = arith.constant 0 : i32
    %169 = arith.cmpi ne, %168, %c0_i32_88 : i32
    scf.if %169 {
      %c0_89 = arith.constant 0 : index
      %c0_90 = arith.constant 0 : index
      %c0_91 = arith.constant 0 : index
      %170 = vector.load %arg10[%c0_89, %c0_90, %c0_91] : memref<1x8x32xf32, #tpu.memory_space<vmem>>, vector<1x8x32xf32>
      %171 = vector.shape_cast %170 : vector<1x8x32xf32> to vector<8x32xf32>
      %172 = vector.shape_cast %165 : vector<8x32xf32> to vector<1x8x32xf32>
      tpu.vector_store %arg10[%c0_89, %c0_90, %c0_91], %172 {strides = array<i32>} : memref<1x8x32xf32, #tpu.memory_space<vmem>>, vector<1x8x32xf32>,
    } else {
    }
    return
  }
  func.func @transform_0(%arg0: i32, %arg1: i32) -> (i32, i32, i32) {
    %c0_i32 = arith.constant 0 : i32
    %c0_i32_0 = arith.constant 0 : i32
    %c0_i32_1 = arith.constant 0 : i32
    return %arg0, %c0_i32, %c0_i32_0 : i32, i32, i32
  }
  func.func @transform_1(%arg0: i32, %arg1: i32) -> (i32, i32) {
    %c0_i32 = arith.constant 0 : i32
    %c0_i32_0 = arith.constant 0 : i32
    %c0_i32_1 = arith.constant 0 : i32
    return %c0_i32, %c0_i32_0 : i32, i32
  }
  func.func @transform_2(%arg0: i32, %arg1: i32) -> (i32, i32) {
    %c0_i32 = arith.constant 0 : i32
    %c0_i32_0 = arith.constant 0 : i32
    %c0_i32_1 = arith.constant 0 : i32
    return %c0_i32, %c0_i32_0 : i32, i32
  }
  func.func @transform_3(%arg0: i32, %arg1: i32) -> (i32, i32, i32) {
    %c0_i32 = arith.constant 0 : i32
    %c0_i32_0 = arith.constant 0 : i32
    %c0_i32_1 = arith.constant 0 : i32
    return %arg1, %c0_i32, %c0_i32_0 : i32, i32, i32
  }
  func.func @transform_4(%arg0: i32, %arg1: i32) -> (i32, i32, i32) {
    %c0_i32 = arith.constant 0 : i32
    %c0_i32_0 = arith.constant 0 : i32
    %c0_i32_1 = arith.constant 0 : i32
    return %arg1, %c0_i32, %c0_i32_0 : i32, i32, i32
  }
  func.func @transform_5(%arg0: i32, %arg1: i32) -> (i32, i32, i32) {
    %c0_i32 = arith.constant 0 : i32
    %c0_i32_0 = arith.constant 0 : i32
    %c0_i32_1 = arith.constant 0 : i32
    return %arg1, %c0_i32, %c0_i32_0 : i32, i32, i32
  }
  func.func @transform_6(%arg0: i32, %arg1: i32) -> (i32, i32, i32) {
    %c0_i32 = arith.constant 0 : i32
    %c0_i32_0 = arith.constant 0 : i32
    %c0_i32_1 = arith.constant 0 : i32
    return %arg1, %c0_i32, %c0_i32_0 : i32, i32, i32
  }
  func.func @transform_7(%arg0: i32, %arg1: i32) -> (i32, i32, i32) {
    %c0_i32 = arith.constant 0 : i32
    %c0_i32_0 = arith.constant 0 : i32
    %c0_i32_1 = arith.constant 0 : i32
    return %arg1, %c0_i32, %c0_i32_0 : i32, i32, i32
  }
  func.func @transform_8(%arg0: i32, %arg1: i32) -> (i32, i32, i32) {
    %c0_i32 = arith.constant 0 : i32
    %c0_i32_0 = arith.constant 0 : i32
    %c0_i32_1 = arith.constant 0 : i32
    return %arg0, %c0_i32, %c0_i32_0 : i32, i32, i32
  }
}

</mosaic_0001>

<bundles_post_ra>
// kernel: tpu_custom_call.1
= control target key start
LH: loop header
LB: loop body
LE: loop exit
PB: predicated region body
PF: predicated region fallthrough
CT: control target
= control target key end

     0   :  { %s1741_s0 = inlined_call_operand.vmem [shape: s32[2,8,1], index: 0, kind: input, shape index: {}]   ;;  %s1742_s1 = inlined_call_operand.vmem [shape: bf16[50,32], index: 1, kind: input, shape index: {}]   ;;  %s1743_s2 = inlined_call_operand.vmem [shape: f32[8,32], index: 2, kind: input, shape index: {}]   ;;  %s1744_s3 = inlined_call_operand.vmem [shape: bf16[2,32,96], index: 3, kind: input, shape index: {}]   ;;  %s1745_s4 = inlined_call_operand.vmem [shape: bf16[2,32,32], index: 4, kind: input, shape index: {}]   ;;  %s1746_s5 = inlined_call_operand.vmem [shape: bf16[2,32,64], index: 5, kind: input, shape index: {}]   ;;  %s1747_s6 = inlined_call_operand.vmem [shape: bf16[2,64,32], index: 6, kind: input, shape index: {}]   ;;  %s1748_s7 = inlined_call_operand.vmem [shape: f32[2,8,96], index: 7, kind: input, shape index: {}]   ;;  %s1749_s8 = inlined_call_operand.hbm [shape: f32[2,8,32], index: 8, kind: output, shape index: {}]  }
   0x1   :  { %1759 = sst [smem:[#allocation17_spill]] %s1741_s0 }
   0x2   :  { %13 = vsyncpa [#allocation6], 0 }
   0x3   :  { %15 = vsyncpa [#allocation6 + $0x1], 0  ;;  %s1503_s27 = smov 0   ;;  %s1505_s28 = smov 0  }
   0x4   :  { %s1507_s29 = smov 0   ;;  %s1509_s30 = smov 0  }
   0x5   :  { %s1511_s9 = smov 0   ;;  %s1513_s10 = smov 0  }
   0x6   :  { %s1515_s11 = smov 0   ;;  %s1517_s12 = smov 0  }
   0x7 LB: > { %1760 = sst [smem:[#allocation8_spill]] %s1411_s27  ;;  %s1121_s13 = sadd.s32 4294967295, %s1439_s12   ;;  %s1439_s12 = sphi %s1517_s12, %s21_s12   ;;  %s1435_s11 = sphi %s1515_s11, %s1784_s11   ;;  %s1431_s10 = sphi %s1513_s10, %s1780_s10   ;;  %s1427_s9 = sphi %s1511_s9, %s1779_s9   ;;  %s1423_s30 = sphi %s1509_s30, %s1778_s30   ;;  %s1419_s29 = sphi %s1507_s29, %s1777_s29   ;;  %s1415_s28 = sphi %s1505_s28, %s1783_s28   ;;  %s1411_s27 = sphi %s1503_s27, %s1782_s27  }
   0x8   : > { %1761 = sst [smem:[#allocation9_spill]] %s1419_s29  ;;  %s1122_s14 = sadd.s32 4294967294, %s1439_s12  }
   0x9   : > { %1762 = sst [smem:[#allocation10_spill]] %s1431_s10  ;;  %s30_s15 = sadd.s32 1, %s1431_s10 }
   0xa   : > { %1763 = sst [smem:[#allocation11_spill]] %s1435_s11  ;;  %p31_p0 = scmp.ge.s32.totalorder %s30_s15, 2 }
   0xb   : > { %1764 = sst [smem:[#allocation12_spill]] %s1439_s12  ;;  %s33_s16 = sadd.s32 1, %s1435_s11 }
   0xc   : > { %p248_p1 = scmp.ne.s32.totalorder %s1419_s29, %s1415_s28  ;;  %p249_p2 = scmp.eq.s32.totalorder %s1121_s13, 3 }
   0xd   : > { %s1786_s15 = smov (%p31_p0, %s30_s15), 0  ;;  %s1788_s16 = smov (!%p31_p0, %s33_s16), %s1435_s11 }
   0xe   : > { %1765 = sst [smem:[#allocation13_spill]] %s1786_s15  ;;  %p1552_p3 = por %p249_p2, %p248_p1 }
   0xf   : > { %p254_p4 = scmp.ne.s32.totalorder %s1415_s28, %s1411_s27  ;;  %p35_p5 = scmp.ge.s32.totalorder %s1788_s16, 2 }
  0x10   : > { %p255_p6 = scmp.eq.s32.totalorder %s1122_s14, 3  ;;  %p1125_p7 = scmp.ge.s32.totalorder %s1439_s12, 1 }
  0x11   : > { %p325_p8 = scmp.lt.s32.totalorder %s1439_s12, 5  ;;  %s1790_s16 = smov (%p35_p5, %s1788_s16), 0 }
  0x12   : > { %1767 = sst [smem:[#allocation14_spill]] %s1790_s16  ;;  %p1562_p9 = por %p255_p6, %p254_p4 }
  0x13   : > { %p326_p10 = pnand %p1125_p7, %p325_p8  ;;  %s235_s19 = ssub.s32 %s1435_s11, %s1790_s16 }
  0x14   : > { %s1768_s18 = scalar_select %p1562_p9, 1, 0 }
  0x15   : > { %s238_s20 = sadd.s32 1, %s1419_s29  ;;  %p236_p11 = scmp.eq.s32.totalorder %s235_s19, 0 }
  0x16   : > { %1769 = sst [smem:[#allocation15_spill]] %s1768_s18  ;;  %329 = sbr.rel (%p326_p10) target bundleno = 2209 (0x8a1), region = 52 }
  0x17   : > { %s1570_s21 = scalar_select %p236_p11, %s1419_s29, %s238_s20  }
  0x18   : > { %s1753_s22 = sand.u32 (!%p326_p10), 1, %s1415_s28   ;;  %p382_p12 = scmp.lt.s32.totalorder (!%p326_p10), %s1427_s9, 1 }
  0x19   : > { %1770 = sst [smem:[#allocation16_spill]] %s1570_s21  ;;  %s1576_s23 = sshll.u32 (!%p326_p10), %s1753_s22, 3 }
  0x1a   : > { %p386_p13 = scmp.lt.s32.totalorder (!%p326_p10), %s1423_s30, 1  ;;  %s1771_s0 = sld [smem:[#allocation17_spill]] (!%p326_p10) }
  0x1b   : > { %s383_s24 = scalar_select %p382_p12, %s1427_s9, 1 }
  0x1c   : > { %s387_s25 = scalar_select %p386_p13, %s1423_s30, 1 }
  0x1d   : > { %s1127_s26 = sshll.u32 %s383_s24, 3  ;;  %s381_s10 = scalar_lea.vmem [#allocation5], %s1576_s23 }
  0x1e   : > { %s1209_s20 = sshll.u32 %s387_s25, 4  ;;  %s1212_s24 = sshll.u32 %s387_s25, 5 }
  0x1f   : > { %s1587_s11 = scalar_lea.vmem %s1744_s3, %s1209_s20  ;;  %s1592_s22 = scalar_lea.vmem %s1745_s4, %s1209_s20 }
  0x20   : > { %s385_s19 = scalar_lea.vmem %s1771_s0, %s1127_s26  ;;  %s1597_s27 = scalar_lea.vmem %s1746_s5, %s1209_s20 }
  0x21   : > { %s1602_s26 = scalar_lea.vmem %s1747_s6, %s1212_s24  ;;  %s1136_s14 = sshll.u32 %s387_s25, 3 }
  0x22   : > { %s1607_s0 = scalar_lea.vmem %s1748_s7, %s1136_s14  ;;  %p1137_p0 = scmp.ne.s32.totalorder %s1423_s30, 0 }
  0x24   : > { %414 = sbr.rel (%p1137_p0) target bundleno = 296 (0x128), region = 56 }
  0x29   : > { %v415_v0 = vld [vmem:[%s385_s19] sm:$0xff]  ;;  %v431_v1 = vld [vmem:[%s1742_s1 + $0x18] sm:$0x1]  ;;  %v1441_v2 = vmov 0   ;;  %vm458_vm0 = vcmask 1040384   ;;  %v1215_v6 = vld [vmem:[%s1742_s1 + $0x10] sm:$0xff]  ;;  %v416_v9 = vlaneseq }
  0x2a   : > { %1314 = vset.pattern.permute.xlu0 %v1441_v2  ;;  %v446_v3 = vunpack.c.l.b16 %v431_v1  ;;  %v1214_v7 = vld [vmem:[%s1742_s1 + $0x8] sm:$0xff]  ;;  %v1213_v8 = vld [vmem:[%s1742_s1] sm:$0xff]  ;;  %v1442_v12 = vmov 0.0   ;;  %vm454_vm2 = vcmask 408576   ;;  %vm475_vm3 = vcmask 261120  }
  0x2b   : > { %419 = vperm.xlu0 %1314, %v415_v0   ;;  %v417_v10 = vand.u32 127, %v416_v9  ;;  %v432_v15 = vld [vmem:[%s1743_s2] sm:$0xff] }
  0x2c   : > { %v450_v4 = vpack.c.b16 %v446_v3, %v446_v3 }
  0x2e   : > { %v460_v5 = vsel %vm458_vm0, %v450_v4, 0 }
  0x2f   : > { %466 = vmatpush.bf16.msra.mxu0 %v460_v5 }
  0x33   : > { %467 = vmatpush.bf16.msra.mxu0 %v1215_v6 }
  0x37   : > { %468 = vmatpush.bf16.msra.mxu0 %v1214_v7 }
  0x3b   : > { %469 = vmatpush.bf16.msra.mxu0 %v1213_v8 }
  0x9d   : > { %v420_v11 = vpop.permute.xlu0 %419 }
  0x9e   : > { %vm421_vm1 = vcmp.eq.s32.totalorder %v417_v10, %v420_v11 }
  0x9f   : > { %v1138_v13 = vsel %vm421_vm1, 1.0, %v1442_v12 }
  0xa0   : > { %v424_v14 = vpack.c.bf16 %v1138_v13, %v1138_v13 }
  0xa2   : > { %1151 = vmatmul.msk.bf16.vlgmr.msra.gmra.mxu0 %vm454_vm2, %v424_v14 }
 0x11f   : > { %v471_v16 = vpop.f32.mrf.mxu0 }
 0x120   : > { %v472_v17 = vadd.f32 %v471_v16, %v432_v15 }
 0x122   : > { %476 = vst.msk [vmem:[#allocation2] sm:$0xff] %vm475_vm3, %v472_v17 }
 0x127   : > { %v473_v18 = vpop.f32.mrf.mxu0 }
 0x128 PF: > { %v1217_v19 = vld [vmem:[%s1587_s11 + $0x8] sm:$0xff]  ;;  %v1216_v20 = vld [vmem:[%s1587_s11] sm:$0xff]  ;;  %vm504_vm4 = vcmask 261120   ;;  %vm522_vm5 = vcmask 781312   ;;  %s1443_s11 = smov 104   ;;  %s1444_s15 = smov 120  }
 0x129   : > { %v1628_v21 = vld [vmem:[#allocation2] sm:$0xff]  ;;  %514 = vmatpush.bf16.msra.mxu0 %v1217_v19  ;;  %s1445_s16 = smov 96   ;;  %s1446_s29 = smov 80   ;;  %vm530_vm6 = vcmask 64512   ;;  %vm567_vm7 = vcmask 1043456   ;;  %vm585_vm8 = vcmask 60416  }
 0x12a   : > { %v486_v22 = vpack.c.bf16 %v1628_v21, %v1628_v21  ;;  %v1315_v23 = vld [vmem:[%s1607_s0] ss:$0 sm:$0xff]  ;;  %s1447_s18 = smov 72   ;;  %s1448_s12 = smov 88   ;;  %vm652_vm9 = vcmask 126016   ;;  %vm719_vm10 = vcmask 191616  }
 0x12b   : > { %s1449_s21 = smov 112   ;;  %s1450_s25 = smov 64   ;;  %vm786_vm11 = vcmask 257216   ;;  %vm925_vm0 = vcmask 523264  }
 0x12c   : > { %s1451_s20 = smov 40   ;;  %s1452_s19 = smov 56  }
 0x12d   : > { %515 = vmatpush.bf16.msra.mxu0 %v1216_v20  ;;  %s1453_s24 = smov 48   ;;  %s1454_s13 = smov 8  }
 0x12e   : > { %s1455_s14 = smov 16   ;;  %p1204_p1 = scmp.ne.s32.totalorder %s1423_s30, 1 }
 0x130   : > { %1160 = vmatmul.msk.bf16.vlgmr.msra.gmra.mxu0 %vm504_vm4, %v486_v22 }
 0x1ad   : > { %v517_v24 = vpop.f32.mrf.mxu0 }
 0x1ae   : > { %v518_v25 = vadd.f32 %v1315_v23, %v517_v24 }
 0x1b0   : > { %v521_v26 = vpack.c.bf16 %v518_v25, %v518_v25 }
 0x1b2   : > { %523 = vst.msk [vmem:[#allocation3] sm:$0xf] %vm522_vm5, %v521_v26 }
 0x1b5   : > { %v519_v27 = vpop.f32.mrf.mxu0 }
 0x1b9   : > { %v721_v28 = vld [vmem:[#allocation3] sm:$0xf] }
 0x1ba   : > { %v587_v29 = vld [vmem:[#allocation3] sm:$0xf]  ;;  %v723_v31 = vunpack.c.l.b16 %v721_v28 }
 0x1bb   : > { %v524_v30 = vld [vmem:[#allocation3] sm:$0xf]  ;;  %v589_v32 = vunpack.c.l.b16 %v587_v29 }
 0x1bc   : > { %v526_v33 = vunpack.c.l.b16 %v524_v30  ;;  %v724_v34 = vpack.c.b16 %v723_v31, %v723_v31  ;;  %v654_v37 = vld [vmem:[#allocation3] sm:$0xf] }
 0x1bd   : > { %v1634_v35 = vpack.c.b16 %v589_v32, %v589_v32  ;;  %v656_v38 = vunpack.c.l.b16 %v654_v37 }
 0x1be   : > { %v527_v36 = vpack.c.b16 %v526_v33, %v526_v33  ;;  %725 = vrot.lane.b32.xlu2 %v724_v34, %s1443_s11  ;;  %s1456_s11 = smov 24  }
 0x1bf   : > { %591 = vrot.lane.b32.xlu1 %v1634_v35, %s1444_s15  ;;  %v1637_v39 = vpack.c.b16 %v656_v38, %v656_v38 }
 0x1c0   : > { %528 = vrot.lane.b32.xlu0 %v527_v36, %s1445_s16 }
 0x1c6   : > { %660 = vrot.lane.b32.xlu2 %v1637_v39, %s1446_s29 }
 0x1c7   : > { %727 = vrot.lane.b32.xlu1 %v724_v34, %s1447_s18 }
 0x1c8   : > { %593 = vrot.lane.b32.xlu0 %v1634_v35, %s1448_s12 }
 0x1d0   : > { %658 = vrot.lane.b32.xlu0 %v1637_v39, %s1449_s21 }
 0x218   : > { %v726_v40 = vpop.permute.xlu2 %725 }
 0x220   : > { %v661_v41 = vpop.permute.xlu2 %660 }
 0x221   : > { %v666_v42 = vsel %vm530_vm6, %v661_v41, 0 }
 0x222   : > { %675 = vmatpush.bf16.xpose.msrb.mxu0 %v666_v42 }
 0x231   : > { %v592_v43 = vpop.permute.xlu1 %591 }
 0x232   : > { %v529_v44 = vpop.permute.xlu0 %528 }
 0x233   : > { %v535_v45 = vsel %vm530_vm6, %v529_v44, 0 }
 0x234   : > { %544 = vmatpush.bf16.xpose.msra.mxu1 %v535_v45 }
 0x239   : > { %v728_v46 = vpop.permute.xlu1 %727 }
 0x23a   : > { %v594_v47 = vpop.permute.xlu0 %593  ;;  %v733_v48 = vsel %vm530_vm6, %v728_v46, 0 }
 0x23b   : > { %1161 = vmatmul.msk.bf16.vlgmr.msra.gmra.mxu1 %vm530_vm6, %v524_v30  ;;  %v599_v49 = vsel %vm530_vm6, %v594_v47, 0 }
 0x23c   : > { %608 = vmatpush.bf16.xpose.msra.mxu3 %v599_v49 }
 0x242   : > { %v659_v50 = vpop.permute.xlu0 %658 }
 0x243   : > { %1163 = vmatmul.msk.bf16.vlgmr.msra.gmra.mxu3 %vm530_vm6, %v592_v43  ;;  %1165 = vmatmul.msk.bf16.vlgmr.msrb.gmra.mxu0 %vm530_vm6, %v659_v50 }
 0x244   : > { %742 = vmatpush.bf16.xpose.msrb.mxu3 %v733_v48 }
 0x253   : > { %1167 = vmatmul.msk.bf16.vlgmr.msrb.gmra.mxu3 %vm530_vm6, %v726_v40 }
 0x2b8   : > { %v546_v51 = vpop.f32.mrf.mxu1 }
 0x2b9   : > { %v550_v52 = vsel %vm530_vm6, %v546_v51, -inf }
 0x2ba   : > { %551 = vmax.xlane.f32.xlu1 %v550_v52 }
 0x2c0   : > { %v548_v53 = vpop.f32.mrf.mxu1  ;;  %v677_v54 = vpop.f32.mrf.mxu0 }
 0x2c1   : > { %v681_v59 = vsel %vm530_vm6, %v677_v54, -inf }
 0x2c6   : > { %v610_v55 = vpop.f32.mrf.mxu3 }
 0x2c7   : > { %v614_v56 = vsel %vm530_vm6, %v610_v55, -inf }
 0x2c8   : > { %615 = vmax.xlane.f32.xlu2 %v614_v56  ;;  %v679_v57 = vpop.f32.mrf.mxu0  ;;  %v1219_v56 = vld [vmem:[%s1592_s22 + $0x8] sm:$0xff] }
 0x2c9   : > { %815 = vmatpush.bf16.msra.mxu0 %v1219_v56  ;;  %v1218_v57 = vld [vmem:[%s1592_s22] sm:$0xff] }
 0x2cd   : > { %816 = vmatpush.bf16.msra.mxu0 %v1218_v57 }
 0x2ce   : > { %v612_v58 = vpop.f32.mrf.mxu3 }
 0x2d0   : > { %682 = vmax.xlane.f32.xlu2 %v681_v59 }
 0x2d6   : > { %v744_v60 = vpop.f32.mrf.mxu3 }
 0x2d7   : > { %v748_v61 = vsel %vm530_vm6, %v744_v60, -inf }
 0x2d8   : > { %749 = vmax.xlane.f32.xlu0 %v748_v61 }
 0x2de   : > { %v746_v62 = vpop.f32.mrf.mxu3 }
 0x2df   : > { %v1316_v62 = vld [vmem:[%s1607_s0 + $0x1] ss:$0 sm:$0xff] }
 0x2e8   : > { %562 = vrot.lane.b32.xlu2 %v527_v36, %s1450_s25 }
 0x2f0   : > { %760 = vrot.lane.b32.xlu2 %v724_v34, %s1451_s20 }
 0x32d   : > { %v552_v63 = vpop.xlane.xlu1 %551 }
 0x32e   : > { %v553_v0 = vsub.f32 %v546_v51, %v552_v63 }
 0x330   : > { %v554_v1 = vmul.f32 1.442695, %v553_v0 }
 0x332   : > { %1323 = vpow2.f32 %v554_v1 }
 0x338   : > { %v1324_v2 = vpop.eup %1323 }
 0x339   : > { %v556_v3 = vsel %vm530_vm6, %v1324_v2, 0.0 }
 0x33a   : > { %557 = vadd.xlane.f32.xlu1 %v556_v3 }
 0x33b   : > { %v616_v4 = vpop.xlane.xlu2 %615 }
 0x33c   : > { %v617_v7 = vsub.f32 %v610_v55, %v616_v4  ;;  %v1457_v4 = vmov 32.0  }
 0x33e   : > { %v618_v9 = vmul.f32 1.442695, %v617_v7 }
 0x343   : > { %v683_v5 = vpop.xlane.xlu2 %682 }
 0x344   : > { %v684_v6 = vsub.f32 %v677_v54, %v683_v5 }
 0x346   : > { %v685_v8 = vmul.f32 1.442695, %v684_v6 }
 0x348   : > { %1325 = vpow2.f32 %v685_v8 }
 0x349   : > { %1327 = vpow2.f32 %v618_v9 }
 0x34b   : > { %v563_v10 = vpop.permute.xlu2 %562  ;;  %v750_v11 = vpop.xlane.xlu0 %749 }
 0x34c   : > { %v569_v12 = vsel %vm567_vm7, %v563_v10, 0  ;;  %v751_v14 = vsub.f32 %v744_v60, %v750_v11 }
 0x34d   : > { %578 = vmatpush.bf16.msra.mxu2 %v569_v12 }
 0x34e   : > { %v1326_v13 = vpop.eup %1325  ;;  %v752_v16 = vmul.f32 1.442695, %v751_v14 }
 0x34f   : > { %v687_v15 = vsel %vm530_vm6, %v1326_v13, 0.0  ;;  %v1328_v17 = vpop.eup %1327 }
 0x350   : > { %688 = vadd.xlane.f32.xlu0 %v687_v15  ;;  %1329 = vpow2.f32 %v752_v16  ;;  %v620_v18 = vsel %vm530_vm6, %v1328_v17, 0.0  ;;  %v1221_v15 = vld [vmem:[%s1597_s27 + $0x8] sm:$0xff]  ;;  %v1220_v16 = vld [vmem:[%s1597_s27] sm:$0xff] }
 0x353   : > { %626 = vrot.lane.b32.xlu1 %v1634_v35, %s1452_s19  ;;  %v761_v27 = vpop.permute.xlu2 %760 }
 0x354   : > { %v766_v30 = vsel %vm567_vm7, %v761_v27, 0 }
 0x356   : > { %v1330_v19 = vpop.eup %1329 }
 0x357   : > { %v754_v20 = vsel %vm530_vm6, %v1330_v19, 0.0 }
 0x358   : > { %621 = vadd.xlane.f32.xlu0 %v620_v18 }
 0x360   : > { %755 = vadd.xlane.f32.xlu0 %v754_v20  ;;  %v1224_v20 = vld [vmem:[%s1602_s26 + $0x10] sm:$0xff] }
 0x374   : > { %693 = vrot.lane.b32.xlu0 %v1637_v39, %s1453_s24 }
 0x3ad   : > { %v558_v22 = vpop.xlane.xlu1 %557 }
 0x3ae   : > { %1331 = vrcp.f32 %v558_v22 }
 0x3b4   : > { %v1332_v23 = vpop.eup %1331 }
 0x3b5   : > { %v560_v24 = vmul.f32 %v1332_v23, %v1324_v2  ;;  %v1223_v23 = vld [vmem:[%s1602_s26 + $0x8] sm:$0xff] }
 0x3b7   : > { %v561_v25 = vpack.c.bf16 %v560_v24, %v560_v24 }
 0x3b9   : > { %1162 = vmatmul.msk.bf16.vlgmr.msra.gmra.mxu2 %vm530_vm6, %v561_v25 }
 0x3c3   : > { %v689_v26 = vpop.xlane.xlu0 %688 }
 0x3c5   : > { %v627_v28 = vpop.permute.xlu1 %626 }
 0x3c6   : > { %v632_v29 = vsel %vm567_vm7, %v627_v28, 0 }
 0x3c7   : > { %641 = vmatpush.bf16.msrb.mxu2 %v632_v29 }
 0x3cb   : > { %775 = vmatpush.bf16.msra.mxu2 %v766_v30  ;;  %v622_v31 = vpop.xlane.xlu0 %621  ;;  %v1317_v30 = vld [vmem:[%s1607_s0 + $0x4] ss:$0 sm:$0xff] }
 0x3cc   : > { %1333 = vrcp.f32 %v622_v31 }
 0x3d2   : > { %v1334_v32 = vpop.eup %1333 }
 0x3d3   : > { %v624_v33 = vmul.f32 %v1334_v32, %v1328_v17  ;;  %v756_v34 = vpop.xlane.xlu0 %755  ;;  %v1225_v17 = vld [vmem:[%s1602_s26 + $0x18] sm:$0xff]  ;;  %v1318_v32 = vld [vmem:[%s1607_s0 + $0x5] ss:$0 sm:$0xff] }
 0x3d4   : > { %1335 = vrcp.f32 %v756_v34  ;;  %933 = vmatpush.bf16.msra.mxu3 %v1225_v17 }
 0x3d5   : > { %v625_v35 = vpack.c.bf16 %v624_v33, %v624_v33  ;;  %1337 = vrcp.f32 %v689_v26 }
 0x3d6   : > { %1339 = vrcp.f32 %v1457_v4 }
 0x3d7   : > { %1164 = vmatmul.msk.bf16.vlgmr.msrb.gmra.mxu2 %vm530_vm6, %v625_v35 }
 0x3d8   : > { %934 = vmatpush.bf16.msra.mxu3 %v1224_v20 }
 0x3da   : > { %v1336_v36 = vpop.eup %1335 }
 0x3db   : > { %v758_v37 = vmul.f32 %v1336_v36, %v1330_v19  ;;  %v1338_v38 = vpop.eup %1337 }
 0x3dc   : > { %v691_v39 = vmul.f32 %v1338_v38, %v1326_v13  ;;  %v1340_v5 = vpop.eup %1339  ;;  %935 = vmatpush.bf16.msra.mxu3 %v1223_v23  ;;  %v1319_v38 = vld [vmem:[%s1607_s0 + $0x2] ss:$0 sm:$0xff] }
 0x3dd   : > { %v759_v40 = vpack.c.bf16 %v758_v37, %v758_v37  ;;  %v827_v6 = vmul.f32 32.0, %v1340_v5  ;;  %vm831_vm12 = vweird.f32 %v1340_v5  ;;  %v1222_v37 = vld [vmem:[%s1602_s26] sm:$0xff] }
 0x3de   : > { %v692_v43 = vpack.c.bf16 %v691_v39, %v691_v39 }
 0x3df   : > { %v828_v7 = vsub.f32 1.0, %v827_v6 }
 0x3e0   : > { %936 = vmatpush.bf16.msra.mxu3 %v1222_v37 }
 0x3e1   : > { %v829_v8 = vmul.f32 %v1340_v5, %v828_v7 }
 0x3e3   : > { %v830_v9 = vadd.f32 %v1340_v5, %v829_v8 }
 0x3e5   : > { %v832_v10 = vsel %vm831_vm12, %v1340_v5, %v830_v9 }
 0x3e6   : > { %v694_v41 = vpop.permute.xlu0 %693 }
 0x3e7   : > { %1168 = vmatmul.msk.bf16.vlgmr.msra.gmra.mxu2 %vm530_vm6, %v759_v40  ;;  %v699_v42 = vsel %vm567_vm7, %v694_v41, 0 }
 0x3e8   : > { %708 = vmatpush.bf16.msrb.mxu1 %v699_v42 }
 0x3eb   : > { %1166 = vmatmul.msk.bf16.vlgmr.msrb.gmra.mxu1 %vm530_vm6, %v692_v43 }
 0x3ec   : > { %883 = vmatpush.bf16.msra.mxu1 %v1221_v15 }
 0x3f0   : > { %884 = vmatpush.bf16.msra.mxu1 %v1220_v16 }
 0x43c   : > { %v580_v44 = vpop.f32.mrf.mxu2 }
 0x43d   : > { %v584_v45 = vpack.c.bf16 %v580_v44, %v580_v44  ;;  %v1320_v44 = vld [vmem:[%s1607_s0 + $0x3] ss:$0 sm:$0xff] }
 0x43f   : > { %586 = vst.msk [vmem:[#allocation4] sm:$0xf] %vm585_vm8, %v584_v45 }
 0x444   : > { %v582_v46 = vpop.f32.mrf.mxu2 }
 0x45a   : > { %v643_v47 = vpop.f32.mrf.mxu2 }
 0x45b   : > { %v647_v48 = vpack.c.bf16 %v643_v47, %v643_v47 }
 0x45d   : > { %649 = vrot.lane.b32.xlu1 %v647_v48, %s1454_s13 }
 0x462   : > { %v645_v49 = vpop.f32.mrf.mxu2 }
 0x468   : > { %v710_v50 = vpop.f32.mrf.mxu1 }
 0x469   : > { %v714_v51 = vpack.c.bf16 %v710_v50, %v710_v50 }
 0x46a   : > { %v777_v52 = vpop.f32.mrf.mxu2 }
 0x46b   : > { %v781_v53 = vpack.c.bf16 %v777_v52, %v777_v52  ;;  %716 = vrot.lane.b32.xlu2 %v714_v51, %s1455_s14 }
 0x46d   : > { %783 = vrot.lane.b32.xlu1 %v781_v53, %s1456_s11 }
 0x470   : > { %v712_v54 = vpop.f32.mrf.mxu1 }
 0x472   : > { %v779_v55 = vpop.f32.mrf.mxu2 }
 0x4c5   : > { %v717_v59 = vpop.permute.xlu2 %716 }
 0x4cf   : > { %v650_v58 = vpop.permute.xlu1 %649 }
 0x4d0   : > { %653 = vst.msk [vmem:[#allocation4] sm:$0xf] %vm652_vm9, %v650_v58 }
 0x4d1   : > { %720 = vst.msk [vmem:[#allocation4] sm:$0xf] %vm719_vm10, %v717_v59 }
 0x4df   : > { %v784_v60 = vpop.permute.xlu1 %783 }
 0x4e0   : > { %787 = vst.msk [vmem:[#allocation4] sm:$0xf] %vm786_vm11, %v784_v60 }
 0x4e7   : > { %v788_v61 = vld [vmem:[#allocation4] sm:$0xf] }
 0x4e8   : > { %1177 = vmatmul.msk.bf16.vlgmr.msra.gmra.mxu0 %vm504_vm4, %v788_v61 }
 0x565   : > { %v818_v63 = vpop.f32.mrf.mxu0 }
 0x566   : > { %v819_v0 = vadd.f32 %v1316_v62, %v818_v63 }
 0x568   : > { %v822_v1 = vadd.f32 %v819_v0, %v1628_v21  ;;  %v1321_v0 = vld [vmem:[%s1607_s0 + $0x6] ss:$0 sm:$0xff] }
 0x56a   : > { %v823_v2 = vsel %vm504_vm4, %v822_v1, 0.0 }
 0x56b   : > { %824 = vadd.xlane.f32.xlu2 %v823_v2  ;;  %v1322_v2 = vld [vmem:[%s1607_s0 + $0x7] ss:$0 sm:$0xff] }
 0x56d   : > { %v820_v3 = vpop.f32.mrf.mxu0 }
 0x5de   : > { %v825_v11 = vpop.xlane.xlu2 %824 }
 0x5df   : > { %v833_v12 = vmul.f32 %v832_v10, %v825_v11 }
 0x5e1   : > { %v834_v21 = vsub.f32 %v822_v1, %v833_v12 }
 0x5e3   : > { %v835_v13 = vmul.f32 %v834_v21, %v834_v21 }
 0x5e5   : > { %v836_v14 = vsel %vm504_vm4, %v835_v13, 0.0 }
 0x5e6   : > { %837 = vadd.xlane.f32.xlu1 %v836_v14 }
 0x659   : > { %v838_v18 = vpop.xlane.xlu1 %837 }
 0x65a   : > { %v839_v19 = vmul.f32 %v838_v18, %v832_v10 }
 0x65c   : > { %v840_v22 = vadd.f32 1e-05, %v839_v19 }
 0x65e   : > { %1341 = vrsqrt.f32 %v840_v22  ;;  %vm847_vm14 = vweird.f32 %v840_v22 }
 0x664   : > { %v1342_v24 = vpop.eup %1341 }
 0x665   : > { %v842_v25 = vmul.f32 %v1342_v24, %v840_v22  ;;  %vm848_vm13 = vweird.f32 %v1342_v24 }
 0x666   : > { %vm849_vm15 = vmor %vm847_vm14, %vm848_vm13 }
 0x667   : > { %v843_v26 = vmul.f32 %v1342_v24, %v842_v25 }
 0x669   : > { %v844_v27 = vmul.f32 0.5, %v843_v26 }
 0x66b   : > { %v845_v28 = vsub.f32 1.5, %v844_v27 }
 0x66d   : > { %v846_v29 = vmul.f32 %v1342_v24, %v845_v28 }
 0x66f   : > { %v850_v31 = vsel %vm849_vm15, %v1342_v24, %v846_v29 }
 0x670   : > { %v851_v33 = vmul.f32 %v850_v31, %v834_v21 }
 0x672   : > { %v853_v34 = vmul.f32 %v1317_v30, %v851_v33 }
 0x674   : > { %v855_v35 = vadd.f32 %v1318_v32, %v853_v34 }
 0x676   : > { %v856_v36 = vpack.c.bf16 %v855_v35, %v855_v35 }
 0x678   : > { %1186 = vmatmul.msk.bf16.vlgmr.msra.gmra.mxu1 %vm504_vm4, %v856_v36 }
 0x6f5   : > { %v886_v39 = vpop.f32.mrf.mxu1 }
 0x6f6   : > { %v887_v40 = vadd.f32 %v1319_v38, %v886_v39 }
 0x6f8   : > { %v890_v41 = vmax.f32 %v887_v40, 0.0 }
 0x6fa   : > { %v891_v42 = vpack.c.bf16 %v890_v41, %v890_v41 }
 0x6fc   : > { %1203 = vmatmul.msk.bf16.vlgmr.msra.gmra.mxu3 %vm925_vm0, %v891_v42 }
 0x6fd   : > { %v888_v43 = vpop.f32.mrf.mxu1 }
 0x77f   : > { %v938_v45 = vpop.f32.mrf.mxu3 }
 0x780   : > { %v939_v46 = vadd.f32 %v1320_v44, %v938_v45 }
 0x782   : > { %v942_v47 = vadd.f32 %v939_v46, %v855_v35 }
 0x784   : > { %v943_v48 = vsel %vm504_vm4, %v942_v47, 0.0 }
 0x785   : > { %944 = vadd.xlane.f32.xlu0 %v943_v48 }
 0x787   : > { %v940_v49 = vpop.f32.mrf.mxu3 }
 0x7f8   : > { %v945_v50 = vpop.xlane.xlu0 %944 }
 0x7f9   : > { %v946_v51 = vmul.f32 %v945_v50, %v832_v10 }
 0x7fb   : > { %v947_v52 = vsub.f32 %v942_v47, %v946_v51 }
 0x7fd   : > { %v948_v53 = vmul.f32 %v947_v52, %v947_v52 }
 0x7ff   : > { %v949_v54 = vsel %vm504_vm4, %v948_v53, 0.0 }
 0x800   : > { %950 = vadd.xlane.f32.xlu2 %v949_v54 }
 0x873   : > { %v951_v55 = vpop.xlane.xlu2 %950 }
 0x874   : > { %v952_v56 = vmul.f32 %v951_v55, %v832_v10 }
 0x876   : > { %v953_v57 = vadd.f32 1e-05, %v952_v56 }
 0x878   : > { %1343 = vrsqrt.f32 %v953_v57  ;;  %vm960_vm2 = vweird.f32 %v953_v57 }
 0x87e   : > { %v1344_v58 = vpop.eup %1343 }
 0x87f   : > { %v955_v59 = vmul.f32 %v1344_v58, %v953_v57  ;;  %vm961_vm1 = vweird.f32 %v1344_v58 }
 0x880   : > { %vm962_vm3 = vmor %vm960_vm2, %vm961_vm1 }
 0x881   : > { %v956_v60 = vmul.f32 %v1344_v58, %v955_v59 }
 0x883   : > { %v957_v61 = vmul.f32 0.5, %v956_v60 }
 0x885   : > { %v958_v62 = vsub.f32 1.5, %v957_v61 }
 0x887   : > { %v959_v63 = vmul.f32 %v1344_v58, %v958_v62 }
 0x889   : > { %v963_v1 = vsel %vm962_vm3, %v1344_v58, %v959_v63 }
 0x88a   : > { %v964_v3 = vmul.f32 %v963_v1, %v947_v52 }
 0x88c   : > { %v966_v4 = vmul.f32 %v1321_v0, %v964_v3  ;;  %973 = sbr.rel (%p1204_p1) target bundleno = 2194 (0x892), region = 60 }
 0x88e   : > { %v968_v5 = vadd.f32 %v1322_v2, %v966_v4 }
 0x890   : > { %969 = vst.msk [vmem:[#allocation2] sm:$0xff] %vm504_vm4, %v968_v5 }
 0x891   : > { %974 = vst.msk [vmem:[%s381_s10] sm:$0xff] %vm504_vm4, %v968_v5 }
 0x892 PF: > { %s1206_s27 = sshll.u32 %s1427_s9, 3  ;;  %s988_s15 = sshll.u32 %s381_s10, 4  ;;  %s989_s15 = int_to_ptr.vmem [resolvable:$true] %s988_s15 }
 0x893   : > { %s986_s26 = scalar_lea.hbm %s1749_s8, %s1206_s27  ;;  %s1772_s30 = sand.u32 1, %s1415_s28  }
 0x894   : > { %s990_s16 = sshll.u32 %s986_s26, 4  ;;  %s976_s29 = scalar_lea.sflag [#allocation6], %s1772_s30  ;;  %s991_s16 = int_to_ptr.hbm [resolvable:$true] %s990_s16 }
 0x895   : > { %s1359_s18 = sshra.s32 %s991_s16, 4  ;;  %s1365_s25 = scalar_lea.hbm %s1749_s8, 16  ;;  %s1360_s18 = int_to_ptr.hbm [resolvable:$true] %s1359_s18 }
 0x896   : > { %s1361_s12 = scalar_lea.hbm %s1360_s18, 8  ;;  %p1366_p6 = scmp.lt.s32.totalorder %s1360_s18, %s1749_s8 }
 0x897   : > { %p1362_p2 = scmp.ne.s32.totalorder %s1360_s18, %s1361_s12  ;;  %p1367_p7 = scmp.lt.s32.totalorder %s1365_s25, %s1361_s12 }
 0x899   : > { %p1363_p4 = pnand %p1362_p2, %p1552_p3  ;;  %p1368_p8 = por %p1367_p7, %p1366_p6 }
 0x89b   : > { %p1364_p5 = pneg %p1363_p4 }
 0x89d   : > { %p1369_p10 = pnand %p1368_p8, %p1364_p5 }
 0x89f   : > { %1372 = shalt.err (!%p1369_p10)
}
 0x8a0   : > { %1226 = dma.vmem_to_hbm [thread:$0]  (%p1552_p3), %s989_s15, 128, %s991_s16, %s976_s29  }
 0x8a1 PF: > { %s1773_s23 = sld [smem:[#allocation12_spill]] }
 0x8a2   : > { %s1774_s10 = sld [smem:[#allocation8_spill]] }
 0x8a7   : > { %p1232_p11 = scmp.ge.s32.totalorder %s1773_s23, 2 }
 0x8a8   : > { %s1002_s13 = sand.u32 1, %s1774_s10  }
 0x8a9   : > { %p1229_p12 = pnand %p1232_p11, %p1562_p9  ;;  %s1003_s14 = scalar_lea.sflag [#allocation6], %s1002_s13 }
 0x8ab   : > { %p1230_p13 = pneg %p1229_p12 }
 0x8ad   : > { %1406 = dma.done.wait (%p1230_p13), %s1003_s14, 128  }
 0x8ae   : > { %1408 = vsyncadd (%p1230_p13), %s1003_s14, 4294967168  ;;  %s21_s12 = sadd.s32 1, %s1773_s23   ;;  %s1776_s11 = sld [smem:[#allocation9_spill]] }
 0x8af   : > { %p18_p0 = scmp.ge.s32.totalorder %s21_s12, 6   ;;  %s1777_s29 = sld [smem:[#allocation16_spill]] }
 0x8b0   : > { %s1778_s30 = sld [smem:[#allocation10_spill]]  ;;  %s1782_s27 = smov %s1415_s28 }
 0x8b1   : > { %s1779_s9 = sld [smem:[#allocation11_spill]] }
 0x8b2   : > { %s1780_s10 = sld [smem:[#allocation13_spill]] }
 0x8b3   : > { %s1781_s17 = sld [smem:[#allocation14_spill]] }
 0x8b4   : > { %s1783_s28 = smov %s1776_s11 }
 0x8b5   :  { %20 = sbr.rel (!%p18_p0) target bundleno = 7 (0x7), region = 110 }
 0x8b9   : > { %s1784_s11 = smov %s1781_s17 }
 0x8ba   :  { %1009 = vsyncpa [#allocation6], 1 }
 0x8bb   :  { %1011 = vsyncpa [#allocation6 + $0x1], 1 }

</bundles_post_ra>
